<compile_context>
chip_gen: v7x
topology: tpu7x:2x2x1
jax: 0.10.0
libtpu: 0.0.40
codegen_flags: <defaults>
</compile_context>

<pallas_src>
import functools
import math

import numpy as np

import jax
import jax.numpy as jnp
from jax.experimental import pallas as pl
from jax.experimental.pallas import tpu as pltpu


def _layernorm(x, eps=1e-12):
    # PyTorch nn.LayerNorm semantics: biased variance, gamma=1, beta=0.
    mean = jnp.mean(x, axis=-1, keepdims=True)
    var = jnp.mean(jnp.square(x - mean), axis=-1, keepdims=True)
    return (x - mean) * jax.lax.rsqrt(var + eps)


# --------------------- Pass 1: per-source-batch seq + hidden DFT ---------------------

def seq_hidden_dft_kernel(x_src_ref,   # (1, S, H)     source slab for batch kb
                          csns_ref,    # (1, 2*ts, S)  stacked [C_S ; -S_S] tile
                          ch_ref,      # (H, H)        cos hidden-DFT matrix
                          sh_ref,      # (H, H)        sin hidden-DFT matrix
                          y_ref):      # (1, 2, ts, H) -> [Y_r ; Y_i] of 2-D DFT
    ts = csns_ref.shape[1] // 2

    # Fused seq-DFT: rows [:ts] are the C_S tile, rows [ts:] are the -S_S tile
    # (negation folded into the constant) -> one MXU op.
    ari = jnp.dot(csns_ref[0], x_src_ref[0],
                  preferred_element_type=jnp.float32)           # (2*ts, H) = [A_r; A_i]

    # Hidden-dim DFT applied to both halves at once (sublane-stacked operands,
    # no lane concatenation anywhere).
    aric = jnp.dot(ari.astype(ch_ref.dtype), ch_ref[...],
                   preferred_element_type=jnp.float32)          # [A_r@C_H ; A_i@C_H]
    aris = jnp.dot(ari.astype(sh_ref.dtype), sh_ref[...],
                   preferred_element_type=jnp.float32)          # [A_r@S_H ; A_i@S_H]

    y_r = aric[:ts] + aris[ts:]                                 # Re(DFT_{s,h} x[kb])
    y_i = aric[ts:] - aris[:ts]                                 # Im(DFT_{s,h} x[kb])
    y_ref[0, 0] = y_r.astype(y_ref.dtype)
    y_ref[0, 1] = y_i.astype(y_ref.dtype)


# --------------- Pass 2: batch-DFT mix (reduction over kb) + LN + FFN + LN -----------

def mix_ffn_kernel(cb_ref, sb_ref,                  # (B*B,) flattened batch cos/sin, SMEM
                   x_in_ref,                        # (1, ts, H)    residual tile (f32)
                   y_ref,                           # (1, 2, ts, H) [Y_r;Y_i] of batch kb
                   w1_ref, b1_ref, w2_ref, b2_ref,  # FFN params
                   o_ref,                           # (1, ts, H)
                   acc_ref,                         # (ts, H) f32 accumulator (real fftn)
                   *, ff_chunk, n_ff_chunks):
    ib = pl.program_id(0)          # output batch index
    kb = pl.program_id(2)          # batch-reduction index (innermost, "arbitrary")
    nb = pl.num_programs(2)

    @pl.when(kb == 0)
    def _init():
        acc_ref[...] = jnp.zeros_like(acc_ref)

    # Batch-DFT contribution of source batch kb to output batch ib (flat SMEM read).
    idx = ib * nb + kb
    cb = cb_ref[idx]
    sb = sb_ref[idx]
    acc_ref[...] += cb * y_ref[0, 0] + sb * y_ref[0, 1]

    @pl.when(kb == nb - 1)
    def _finalize():
        ts, H = acc_ref.shape
        x = x_in_ref[0]                                        # (ts, H) f32
        ln1 = _layernorm(x + acc_ref[...])

        # FNetFeedForwardLayer: Linear -> exact GELU -> Linear (dropout = identity),
        # chunked over the inner dim F to bound the (ts, F) intermediates.
        ln1c = ln1.astype(w1_ref.dtype)
        h2 = jnp.zeros((ts, H), jnp.float32)
        for c in range(n_ff_chunks):                           # static unrolled loop
            lo = c * ff_chunk
            hi = lo + ff_chunk
            h1 = jnp.dot(ln1c, w1_ref[:, lo:hi],
                         preferred_element_type=jnp.float32) + b1_ref[:, lo:hi]
            act = jax.nn.gelu(h1, approximate=False)
            h2 = h2 + jnp.dot(act.astype(w2_ref.dtype), w2_ref[lo:hi, :],
                              preferred_element_type=jnp.float32)
        h2 = h2 + b2_ref[...]
        # TODO(synk): nn.Dropout omitted (eval mode) — torch RNG stream not reproducible.

        o_ref[0] = _layernorm(ln1 + h2).astype(o_ref.dtype)


# ------------------------------------ wrapper ----------------------------------------

def _pick_seq_tile(S, max_tile=256):
    """Largest tile <= max_tile that divides S (smaller default fits v7x VMEM)."""
    if S <= max_tile:
        return S
    for cand in (256, 128, 64, 32, 16, 8):
        if cand <= max_tile and S % cand == 0:
            return cand
    return S


def _pick_ff_chunk(F, max_chunk=1024):
    if F <= max_chunk:
        return F
    for cand in (1024, 768, 512, 384, 256, 128):
        if cand <= max_chunk and F % cand == 0:
            return cand
    return F


def _default_vmem_limit():
    """~7/8 of physical VMEM, capped at 100 MiB; never request the full v7x 64 MiB."""
    try:
        cap = int(pltpu.get_tpu_info().vmem_capacity_bytes)
    except Exception:
        cap = 128 * 1024 * 1024
    return min(cap * 7 // 8, 100 * 1024 * 1024)


@functools.lru_cache(maxsize=16)
def _dft_constants(B, S, H, seq_tile, dft_dtype_name):
    """Build (and cache) all DFT constant matrices once per shape/config."""
    dft_dtype = jnp.dtype(dft_dtype_name)
    two_pi = 2.0 * np.pi
    b = np.arange(B, dtype=np.float64)
    s = np.arange(S, dtype=np.float64)
    h = np.arange(H, dtype=np.float64)

    theta_b = two_pi * np.outer(b, b) / B
    cb = np.cos(theta_b).astype(np.float32).reshape(-1)     # (B*B,) flat -> SMEM
    sb = np.sin(theta_b).astype(np.float32).reshape(-1)

    theta_s = two_pi * np.outer(s, s) / S
    cs = np.cos(theta_s)
    nss = -np.sin(theta_s)                                   # negation folded here
    n_st = S // seq_tile
    csns = np.concatenate(                                   # (n_st, 2*ts, S)
        [cs.reshape(n_st, seq_tile, S), nss.reshape(n_st, seq_tile, S)], axis=1)

    theta_h = two_pi * np.outer(h, h) / H
    ch = np.cos(theta_h)                                     # (H, H)
    sh = np.sin(theta_h)                                     # (H, H)

    return (jnp.asarray(cb), jnp.asarray(sb),
            jnp.asarray(csns, dtype=dft_dtype),
            jnp.asarray(ch, dtype=dft_dtype),
            jnp.asarray(sh, dtype=dft_dtype))


def fnet_encoder_block(x, w1, b1, w2, b2, *,
                       seq_tile=None,
                       ff_chunk=None,
                       dft_dtype=jnp.float32,     # bf16 recommended for production shapes
                       param_dtype=jnp.float32,   # bf16 FFN weights (MXU operands, f32 accum)
                       mix_dtype=jnp.float32,     # dtype of the intermediate 2-D DFT in HBM
                       vmem_limit_bytes=None):
    """x: (B, S, H) float32; returns (B, S, H) float32."""
    B, S, H = x.shape
    F = w1.shape[1]
    if seq_tile is None:
        seq_tile = _pick_seq_tile(S)
    assert S % seq_tile == 0, "seq_tile must divide seq length"
    ts = seq_tile
    n_st = S // ts
    if ff_chunk is None:
        ff_chunk = _pick_ff_chunk(F)
    assert F % ff_chunk == 0, "ff_chunk must divide dim_ff"
    n_ff_chunks = F // ff_chunk
    if vmem_limit_bytes is None:
        vmem_limit_bytes = _default_vmem_limit()

    xf = x.astype(jnp.float32)
    x_src = xf.astype(dft_dtype)   # operand of the seq-DFT matmul

    cb, sb, csns, ch, sh = _dft_constants(B, S, H, ts, jnp.dtype(dft_dtype).name)

    # ---- Pass 1: per-source-batch seq + hidden DFT (heavy matmuls, run B*n_st times)
    y = pl.pallas_call(
        seq_hidden_dft_kernel,
        out_shape=jax.ShapeDtypeStruct((B, 2, S, H), mix_dtype),
        grid=(B, n_st),
        in_specs=[
            pl.BlockSpec((1, S, H), lambda kb, is_: (kb, 0, 0)),          # x[kb] slab
            pl.BlockSpec((1, 2 * ts, S), lambda kb, is_: (is_, 0, 0)),    # [C_S ; -S_S] tile
            pl.BlockSpec((H, H), lambda kb, is_: (0, 0)),                 # C_H
            pl.BlockSpec((H, H), lambda kb, is_: (0, 0)),                 # S_H
        ],
        out_specs=pl.BlockSpec((1, 2, ts, H), lambda kb, is_: (kb, 0, is_, 0)),
        compiler_params=pltpu.CompilerParams(
            dimension_semantics=("parallel", "parallel"),
            vmem_limit_bytes=vmem_limit_bytes),
    )(x_src, csns, ch, sh)

    # ---- Pass 2: batch mix (kb reduction) + residual + LN + chunked FFN + LN
    w1c = w1.astype(param_dtype)
    w2c = w2.astype(param_dtype)
    b1_2d = b1.reshape(1, F).astype(jnp.float32)
    b2_2d = b2.reshape(1, H).astype(jnp.float32)

    kernel = functools.partial(mix_ffn_kernel,
                               ff_chunk=ff_chunk, n_ff_chunks=n_ff_chunks)

    out = pl.pallas_call(
        kernel,
        out_shape=jax.ShapeDtypeStruct((B, S, H), jnp.float32),
        grid=(B, n_st, B),
        in_specs=[
            pl.BlockSpec(memory_space=pltpu.MemorySpace.SMEM),                 # cb (B*B,)
            pl.BlockSpec(memory_space=pltpu.MemorySpace.SMEM),                 # sb (B*B,)
            pl.BlockSpec((1, ts, H), lambda ib, is_, kb: (ib, is_, 0)),        # x residual
            pl.BlockSpec((1, 2, ts, H), lambda ib, is_, kb: (kb, 0, is_, 0)),  # [Y_r;Y_i] kb
            pl.BlockSpec((H, F), lambda ib, is_, kb: (0, 0)),                  # w1
            pl.BlockSpec((1, F), lambda ib, is_, kb: (0, 0)),                  # b1
            pl.BlockSpec((F, H), lambda ib, is_, kb: (0, 0)),                  # w2
            pl.BlockSpec((1, H), lambda ib, is_, kb: (0, 0)),                  # b2
        ],
        out_specs=pl.BlockSpec((1, ts, H), lambda ib, is_, kb: (ib, is_, 0)),
        scratch_shapes=[
            pltpu.VMEM((ts, H), jnp.float32),      # real(fftn) accumulator
        ],
        compiler_params=pltpu.CompilerParams(
            dimension_semantics=("parallel", "parallel", "arbitrary"),
            vmem_limit_bytes=vmem_limit_bytes),
    )(cb, sb, xf, y, w1c, b1_2d, w2c, b2_2d)

    return out


def _reference(x, w1, b1, w2, b2):
    """Pure-JAX reference mirroring the PyTorch forward (dropout = identity)."""
    mix = jnp.real(jnp.fft.fftn(x))
    ln1 = _layernorm(x + mix)
    h = jax.nn.gelu(ln1 @ w1 + b1, approximate=False)
    ff = h @ w2 + b2
    return _layernorm(ln1 + ff)


if __name__ == "__main__":
    # Small shapes consistent with the module: (batch, seq, hidden), dim_ff.
    B, S, H, F = 2, 8, 32, 128

    key = jax.random.PRNGKey(0)
    kx, k1, k2, k3, k4 = jax.random.split(key, 5)

    x = jax.random.normal(kx, (B, S, H), dtype=jnp.float32)

    # Deterministic Linear params (torch.nn.Linear default +-1/sqrt(fan_in) bound).
    bound1 = 1.0 / math.sqrt(H)
    bound2 = 1.0 / math.sqrt(F)
    w1 = jax.random.uniform(k1, (H, F), jnp.float32, -bound1, bound1)
    b1 = jax.random.uniform(k2, (F,), jnp.float32, -bound1, bound1)
    w2 = jax.random.uniform(k3, (F, H), jnp.float32, -bound2, bound2)
    b2 = jax.random.uniform(k4, (H,), jnp.float32, -bound2, bound2)

    out = fnet_encoder_block(x, w1, b1, w2, b2)
    out = jax.block_until_ready(out)

    ref = _reference(x, w1, b1, w2, b2)
    assert out.shape == (B, S, H)
    assert jnp.allclose(out, ref, atol=2e-3, rtol=2e-3), "mismatch vs reference"

    print("KERNEL_OK")
</pallas_src>

<mosaic_0001>
module attributes {stable_mosaic.version = 11 : i64} {
  func.func @seq_hidden_dft_kernel(%arg0: i32, %arg1: i32, %arg2: memref<1x8x32xf32, #tpu.memory_space<vmem>>, %arg3: memref<1x16x8xf32, #tpu.memory_space<vmem>>, %arg4: memref<32x32xf32, #tpu.memory_space<vmem>>, %arg5: memref<32x32xf32, #tpu.memory_space<vmem>>, %arg6: memref<1x2x8x32xf32, #tpu.memory_space<vmem>>) attributes {dimension_semantics = [#tpu.dimension_semantics<parallel>, #tpu.dimension_semantics<parallel>], iteration_bounds = array<i64: 2, 1>, scalar_prefetch = 0 : i64, scratch_operands = 0 : i64, tpu.core_type = #tpu.core_type<tc>, window_params = [{transform_indices = @transform_0, window_bounds = array<i64: 1, 8, 32>}, {transform_indices = @transform_1, window_bounds = array<i64: 1, 16, 8>}, {pipeline_mode = #tpu.pipeline_mode<synchronous>, transform_indices = @transform_2, window_bounds = array<i64: 32, 32>}, {pipeline_mode = #tpu.pipeline_mode<synchronous>, transform_indices = @transform_3, window_bounds = array<i64: 32, 32>}, {transform_indices = @transform_4, window_bounds = array<i64: 1, 2, 8, 32>}]} {
    %c0 = arith.constant 0 : index
    %c0_0 = arith.constant 0 : index
    %c0_1 = arith.constant 0 : index
    %0 = vector.load %arg3[%c0, %c0_0, %c0_1] : memref<1x16x8xf32, #tpu.memory_space<vmem>>, vector<1x16x8xf32>
    %1 = vector.shape_cast %0 : vector<1x16x8xf32> to vector<16x8xf32>
    %c0_2 = arith.constant 0 : index
    %c0_3 = arith.constant 0 : index
    %c0_4 = arith.constant 0 : index
    %2 = vector.load %arg2[%c0_2, %c0_3, %c0_4] : memref<1x8x32xf32, #tpu.memory_space<vmem>>, vector<1x8x32xf32>
    %3 = vector.shape_cast %2 : vector<1x8x32xf32> to vector<8x32xf32>
    %cst = arith.constant dense<0.000000e+00> : vector<16x32xf32>
    %4 = tpu.matmul %1, %3, %cst {dimension_numbers = #tpu.dot_dimension_numbers<[1], [0], [0], [1], [0, 0, 1, 1], [], []>} : vector<16x8xf32>, vector<8x32xf32>, vector<16x32xf32> -> vector<16x32xf32>
    %c0_5 = arith.constant 0 : index
    %c0_6 = arith.constant 0 : index
    %5 = vector.load %arg4[%c0_5, %c0_6] : memref<32x32xf32, #tpu.memory_space<vmem>>, vector<32x32xf32>
    %cst_7 = arith.constant dense<0.000000e+00> : vector<16x32xf32>
    %6 = tpu.matmul %4, %5, %cst_7 {dimension_numbers = #tpu.dot_dimension_numbers<[1], [0], [0], [1], [0, 0, 1, 1], [], []>} : vector<16x32xf32>, vector<32x32xf32>, vector<16x32xf32> -> vector<16x32xf32>
    %c0_8 = arith.constant 0 : index
    %c0_9 = arith.constant 0 : index
    %7 = vector.load %arg5[%c0_8, %c0_9] : memref<32x32xf32, #tpu.memory_space<vmem>>, vector<32x32xf32>
    %cst_10 = arith.constant dense<0.000000e+00> : vector<16x32xf32>
    %8 = tpu.matmul %4, %7, %cst_10 {dimension_numbers = #tpu.dot_dimension_numbers<[1], [0], [0], [1], [0, 0, 1, 1], [], []>} : vector<16x32xf32>, vector<32x32xf32>, vector<16x32xf32> -> vector<16x32xf32>
    %9 = vector.extract_strided_slice %6 {offsets = [0, 0], sizes = [8, 32], strides = [1, 1]} : vector<16x32xf32> to vector<8x32xf32>
    %10 = vector.extract_strided_slice %8 {offsets = [8, 0], sizes = [8, 32], strides = [1, 1]} : vector<16x32xf32> to vector<8x32xf32>
    %11 = arith.addf %9, %10 : vector<8x32xf32>
    %12 = vector.extract_strided_slice %6 {offsets = [8, 0], sizes = [8, 32], strides = [1, 1]} : vector<16x32xf32> to vector<8x32xf32>
    %13 = vector.extract_strided_slice %8 {offsets = [0, 0], sizes = [8, 32], strides = [1, 1]} : vector<16x32xf32> to vector<8x32xf32>
    %14 = arith.subf %12, %13 : vector<8x32xf32>
    %c0_11 = arith.constant 0 : index
    %c0_12 = arith.constant 0 : index
    %c0_13 = arith.constant 0 : index
    %c0_14 = arith.constant 0 : index
    %15 = vector.load %arg6[%c0_11, %c0_12, %c0_13, %c0_14] : memref<1x2x8x32xf32, #tpu.memory_space<vmem>>, vector<1x1x8x32xf32>
    %16 = vector.shape_cast %15 : vector<1x1x8x32xf32> to vector<8x32xf32>
    %17 = vector.shape_cast %11 : vector<8x32xf32> to vector<1x1x8x32xf32>
    tpu.vector_store %arg6[%c0_11, %c0_12, %c0_13, %c0_14], %17 {strides = array<i32>} : memref<1x2x8x32xf32, #tpu.memory_space<vmem>>, vector<1x1x8x32xf32>,
    %c0_15 = arith.constant 0 : index
    %c1 = arith.constant 1 : index
    %c0_16 = arith.constant 0 : index
    %c0_17 = arith.constant 0 : index
    %18 = vector.load %arg6[%c0_15, %c1, %c0_16, %c0_17] : memref<1x2x8x32xf32, #tpu.memory_space<vmem>>, vector<1x1x8x32xf32>
    %19 = vector.shape_cast %18 : vector<1x1x8x32xf32> to vector<8x32xf32>
    %20 = vector.shape_cast %14 : vector<8x32xf32> to vector<1x1x8x32xf32>
    tpu.vector_store %arg6[%c0_15, %c1, %c0_16, %c0_17], %20 {strides = array<i32>} : memref<1x2x8x32xf32, #tpu.memory_space<vmem>>, vector<1x1x8x32xf32>,
    return
  }
  func.func @transform_0(%arg0: i32, %arg1: i32) -> (i32, i32, i32) {
    %c0_i32 = arith.constant 0 : i32
    %c0_i32_0 = arith.constant 0 : i32
    %c0_i32_1 = arith.constant 0 : i32
    return %arg0, %c0_i32, %c0_i32_0 : i32, i32, i32
  }
  func.func @transform_1(%arg0: i32, %arg1: i32) -> (i32, i32, i32) {
    %c0_i32 = arith.constant 0 : i32
    %c0_i32_0 = arith.constant 0 : i32
    %c0_i32_1 = arith.constant 0 : i32
    return %arg1, %c0_i32, %c0_i32_0 : i32, i32, i32
  }
  func.func @transform_2(%arg0: i32, %arg1: i32) -> (i32, i32) {
    %c0_i32 = arith.constant 0 : i32
    %c0_i32_0 = arith.constant 0 : i32
    %c0_i32_1 = arith.constant 0 : i32
    return %c0_i32, %c0_i32_0 : i32, i32
  }
  func.func @transform_3(%arg0: i32, %arg1: i32) -> (i32, i32) {
    %c0_i32 = arith.constant 0 : i32
    %c0_i32_0 = arith.constant 0 : i32
    %c0_i32_1 = arith.constant 0 : i32
    return %c0_i32, %c0_i32_0 : i32, i32
  }
  func.func @transform_4(%arg0: i32, %arg1: i32) -> (i32, i32, i32, i32) {
    %c0_i32 = arith.constant 0 : i32
    %c0_i32_0 = arith.constant 0 : i32
    %c0_i32_1 = arith.constant 0 : i32
    return %arg0, %c0_i32, %arg1, %c0_i32_0 : i32, i32, i32, i32
  }
}

</mosaic_0001>

<bundles_post_ra>
// kernel: tpu_custom_call.1
= control target key start
LH: loop header
LB: loop body
LE: loop exit
PB: predicated region body
PF: predicated region fallthrough
CT: control target
= control target key end

     0   :  { %9 = vsyncpa [#allocation3], 0  ;;  %s1379_s0 = inlined_call_operand.hbm [shape: f32[2,8,32], index: 0, kind: input, shape index: {}]   ;;  %s1380_s1 = inlined_call_operand.hbm [shape: f32[1,16,8], index: 1, kind: input, shape index: {}]   ;;  %s1381_s2 = inlined_call_operand.hbm [shape: f32[32,32], index: 2, kind: input, shape index: {}]   ;;  %s1382_s3 = inlined_call_operand.hbm [shape: f32[32,32], index: 3, kind: input, shape index: {}]   ;;  %s1383_s4 = inlined_call_operand.hbm [shape: f32[2,2,8,32], index: 4, kind: output, shape index: {}]  }
   0x1   :  { %11 = vsyncpa [#allocation3 + $0x1], 0 }
   0x2   :  { %12 = vsyncpa [#allocation6], 0 }
   0x3   :  { %13 = vsyncpa [#allocation9], 0 }
   0x4   :  { %14 = vsyncpa [#allocation4], 0 }
   0x5   :  { %16 = vsyncpa [#allocation4 + $0x1], 0  ;;  %s1086_s15 = smov 0   ;;  %s1088_s16 = smov 0  }
   0x6   :  { %s1090_s17 = smov 0   ;;  %s1092_s18 = smov 0  }
   0x7   :  { %s1094_s19 = smov 0   ;;  %s1096_s20 = smov 0  }
   0x8 LB: > { %s663_s21 = sadd.s32 4294967295, %s1050_s20   ;;  %s664_s22 = sadd.s32 4294967294, %s1050_s20   ;;  %s1050_s20 = sphi %s1096_s20, %s22_s20   ;;  %s1046_s19 = sphi %s1094_s19, %s1410_s19   ;;  %s1042_s18 = sphi %s1092_s18, %s1409_s18   ;;  %s1038_s17 = sphi %s1090_s17, %s1408_s17   ;;  %s1034_s16 = sphi %s1088_s16, %s1407_s16   ;;  %s1030_s15 = sphi %s1086_s15, %s1406_s15  }
   0x9   : > { %p54_p0 = scmp.ne.s32.totalorder %s1034_s16, %s1030_s15  ;;  %p1120_p1 = scmp.eq.s32.totalorder %s663_s21, 0 }
   0xa   : > { %p1124_p2 = scmp.eq.s32.totalorder %s663_s21, 1  ;;  %p154_p3 = scmp.eq.s32.totalorder %s664_s22, 1 }
   0xb   : > { %s1389_s23 = scalar_select %p1120_p1, 1, 0 }
   0xc   : > { %s1390_s24 = scalar_select %p1124_p2, 1, 0 }
   0xd   : > { %p1130_p4 = por %p1120_p1, %p54_p0  ;;  %p665_p5 = scmp.ge.s32.totalorder %s1050_s20, 1 }
   0xe   : > { %p1135_p6 = por %p154_p3, %p54_p0  ;;  %p161_p7 = scmp.lt.s32.totalorder %s1050_s20, 3 }
   0xf   : > { %s1391_s25 = scalar_select %p1130_p4, 1, 0 }
  0x10   : > { %s1392_s26 = scalar_select %p1135_p6, 1, 0 }
  0x11   : > { %p1140_p8 = pnand %p665_p5, %p161_p7  ;;  %s1052_s28 = smov [#allocation5]  }
  0x12   : > { %1393 = sst [smem:[#allocation15_spill]] %s1392_s26  ;;  %s176_s29 = sshll.u32 %s1052_s28, 4  ;;  %s1144_s29 = int_to_ptr.vmem [resolvable:$true] %s176_s29 }
  0x13   : > { %s1394_s27 = scalar_select %p1140_p8, 1, 0 }
  0x14   : > { %p765_p9 = pneg %p1140_p8  ;;  %s1053_s5 = smov [#allocation7]  }
  0x15   : > { %s189_s6 = sshll.u32 %s1053_s5, 4  ;;  %s1054_s7 = smov [#allocation8]   ;;  %s1155_s6 = int_to_ptr.vmem [resolvable:$true] %s189_s6 }
  0x16   : > { %p1151_p11 = pnand %p765_p9, %p1120_p1  ;;  %s1157_s8 = sshll.u32 %s1054_s7, 4  ;;  %s203_s8 = int_to_ptr.vmem [resolvable:$true] %s1157_s8 }
  0x17   : > { %s846_s11 = scalar_lea.hbm %s1380_s1, 256 }
  0x18   : > { %p847_p12 = scmp.ne.s32.totalorder %s1380_s1, %s846_s11  ;;  %p1167_p13 = pneg %p1151_p11 }
  0x19   : > { %p853_p5 = scmp.lt.u32.totalorder %s846_s11, %s1380_s1 }
  0x1a   : > { %p849_p0 = pnand %p1167_p13, %p847_p12 }
  0x1c   : > { %p850_p3 = pneg %p849_p0 }
  0x1e   : > { %p855_p7 = pnand %p853_p5, %p850_p3 }
  0x20   : > { %858 = shalt.err (!%p855_p7)
}
  0x21   : > { %s859_s28 = scalar_lea.vmem %s1144_s29, 256  ;;  %p867_p1 = scmp.lt.s32.totalorder %s1144_s29, %s1144_s29 }
  0x22   : > { %p860_p9 = scmp.ne.s32.totalorder %s1144_s29, %s859_s28  ;;  %p868_p4 = scmp.lt.s32.totalorder %s859_s28, %s859_s28 }
  0x24   : > { %p862_p10 = pnand %p860_p9, %p1167_p13  ;;  %p869_p12 = por %p868_p4, %p867_p1 }
  0x26   : > { %p863_p6 = pneg %p862_p10 }
  0x28   : > { %p870_p0 = pnand %p869_p12, %p863_p6 }
  0x2a   : > { %873 = shalt.err (!%p870_p0)
}
  0x2b   : > { %s1055_s5 = smov 128   ;;  %s1056_s7 = smov 8  }
  0x2c   : > { %768 = dma.hbm_to_vmem [thread:$0]  (!%p1151_p11), %s1380_s1, 256, %s1144_s29, [#allocation6], %s1055_s5, %s1055_s5, %s1056_s7  }
  0x2d   : > { %s874_s13 = scalar_lea.hbm %s1381_s2, 512 }
  0x2e   : > { %p875_p1 = scmp.ne.s32.totalorder %s1381_s2, %s874_s13  ;;  %p881_p10 = scmp.lt.u32.totalorder %s874_s13, %s1381_s2 }
  0x30   : > { %p877_p4 = pnand %p875_p1, %p1167_p13 }
  0x32   : > { %p878_p6 = pneg %p877_p4 }
  0x34   : > { %p883_p3 = pnand %p881_p10, %p878_p6 }
  0x36   : > { %886 = shalt.err (!%p883_p3)
}
  0x37   : > { %s887_s29 = scalar_lea.vmem %s1155_s6, 512  ;;  %p895_p12 = scmp.lt.s32.totalorder %s1155_s6, %s1155_s6 }
  0x38   : > { %p888_p5 = scmp.ne.s32.totalorder %s1155_s6, %s887_s29  ;;  %p896_p0 = scmp.lt.s32.totalorder %s887_s29, %s887_s29 }
  0x3a   : > { %p890_p7 = pnand %p888_p5, %p1167_p13  ;;  %p897_p1 = por %p896_p0, %p895_p12 }
  0x3c   : > { %p891_p9 = pneg %p890_p7 }
  0x3e   : > { %p898_p4 = pnand %p897_p1, %p891_p9 }
  0x40   : > { %901 = shalt.err (!%p898_p4)
}
  0x41   : > { %771 = dma.hbm_to_vmem [thread:$0]  (!%p1151_p11), %s1381_s2, 512, %s1155_s6, [#allocation6], %s1055_s5, %s1055_s5, %s1056_s7  }
  0x42   : > { %s902_s12 = scalar_lea.hbm %s1382_s3, 512 }
  0x43   : > { %p903_p6 = scmp.ne.s32.totalorder %s1382_s3, %s902_s12  ;;  %p909_p5 = scmp.lt.u32.totalorder %s902_s12, %s1382_s3 }
  0x45   : > { %p905_p10 = pnand %p903_p6, %p1167_p13 }
  0x47   : > { %p906_p3 = pneg %p905_p10 }
  0x49   : > { %p911_p7 = pnand %p909_p5, %p906_p3 }
  0x4b   : > { %914 = shalt.err (!%p911_p7)
}
  0x4c   : > { %s915_s29 = scalar_lea.vmem %s203_s8, 512  ;;  %p923_p1 = scmp.lt.s32.totalorder %s203_s8, %s203_s8 }
  0x4d   : > { %p916_p9 = scmp.ne.s32.totalorder %s203_s8, %s915_s29  ;;  %p924_p4 = scmp.lt.s32.totalorder %s915_s29, %s915_s29 }
  0x4f   : > { %p918_p12 = pnand %p916_p9, %p1167_p13  ;;  %p925_p8 = por %p924_p4, %p923_p1 }
  0x51   : > { %p919_p0 = pneg %p918_p12 }
  0x53   : > { %p926_p2 = pnand %p925_p8, %p919_p0 }
  0x55   : > { %929 = shalt.err (!%p926_p2)
}
  0x56   : > { %774 = dma.hbm_to_vmem [thread:$0]  (!%p1151_p11), %s1382_s3, 512, %s203_s8, [#allocation9], %s1055_s5, %s1055_s5, %s1056_s7  }
  0x57   : > { %s41_s14 = sadd.s32 1, %s1038_s17  ;;  %s34_s30 = sadd.s32 1, %s1046_s19 }
  0x58   : > { %p48_p2 = scmp.ne.s32.totalorder %s1038_s17, %s1034_s16  ;;  %p36_p8 = scmp.ge.s32.totalorder %s34_s30, 2 }
  0x59   : > { %p49_p13 = scmp.eq.s32.totalorder %s1050_s20, 0  ;;  %p1397_p6 = scmp.ne.s32.totalorder %s1390_s24, 0 }
  0x5a   : > { %p786_p3 = scmp.lt.s32.totalorder %s1050_s20, 2  ;;  %s1412_s30 = smov (%p36_p8, %s34_s30), 0 }
  0x5b   : > { %p1246_p10 = por %p1397_p6, %p48_p2  ;;  %p50_p5 = por %p49_p13, %p48_p2 }
  0x5c   : > { %s216_s10 = sand.u32 1, %s1038_s17   ;;  %s38_s11 = ssub.s32 %s1046_s19, %s1412_s30 }
  0x5d   : > { %p39_p7 = scmp.eq.s32.totalorder %s38_s11, 0  ;;  %s670_s8 = sshll.u32 %s216_s10, 3 }
  0x5e   : > { %s671_s5 = sshll.u32 %s1046_s19, 7  ;;  %s220_s21 = scalar_lea.vmem [#allocation2], %s670_s8 }
  0x5f   : > { %s1258_s7 = scalar_select %p39_p7, %s1038_s17, %s41_s14  }
  0x60   : > { %s1263_s24 = scalar_lea.hbm %s1379_s0, %s671_s5  ;;  %s227_s22 = sshll.u32 %s220_s21, 4  ;;  %s1265_s22 = int_to_ptr.vmem [resolvable:$true] %s227_s22 }
  0x61   : > { %p1269_p11 = pnand %p786_p3, %p50_p5  ;;  %s217_s29 = scalar_lea.sflag [#allocation3], %s216_s10 }
  0x62   : > { %s930_s6 = scalar_lea.hbm %s1263_s24, 128  ;;  %s935_s11 = scalar_lea.hbm %s1379_s0, 256 }
  0x63   : > { %p931_p9 = scmp.ne.s32.totalorder %s1263_s24, %s930_s6  ;;  %p932_p12 = pneg %p1269_p11 }
  0x64   : > { %p936_p4 = scmp.lt.u32.totalorder %s1263_s24, %s1379_s0  ;;  %p937_p2 = scmp.lt.u32.totalorder %s935_s11, %s930_s6 }
  0x65   : > { %p933_p0 = pnand %p932_p12, %p931_p9  ;;  %p939_p13 = scmp.lt.u32.totalorder %s930_s6, %s1263_s24 }
  0x66   : > { %p938_p8 = por %p937_p2, %p936_p4 }
  0x67   : > { %p934_p1 = pneg %p933_p0 }
  0x68   : > { %p940_p6 = por %p939_p13, %p938_p8 }
  0x6a   : > { %p941_p3 = pnand %p940_p6, %p934_p1 }
  0x6c   : > { %944 = shalt.err (!%p941_p3)
}
  0x6d   : > { %s945_s10 = scalar_lea.vmem %s1265_s22, 128  ;;  %s1057_s12 = smov [#allocation2]  }
  0x6e   : > { %p946_p5 = scmp.ne.s32.totalorder %s1265_s22, %s945_s10  ;;  %s950_s13 = sshll.u32 %s1057_s12, 4  ;;  %s951_s13 = int_to_ptr.vmem [resolvable:$false] %s950_s13 }
  0x6f   : > { %s952_s21 = scalar_lea.vmem %s951_s13, 256  ;;  %p953_p0 = scmp.lt.s32.totalorder %s1265_s22, %s951_s13 }
  0x70   : > { %p948_p7 = pnand %p946_p5, %p932_p12  ;;  %p954_p4 = scmp.lt.s32.totalorder %s952_s21, %s945_s10 }
  0x72   : > { %p949_p9 = pneg %p948_p7  ;;  %p955_p2 = por %p954_p4, %p953_p0 }
  0x74   : > { %p956_p8 = pnand %p955_p2, %p949_p9 }
  0x76   : > { %959 = shalt.err (!%p956_p8)
}
  0x77   : > { %778 = dma.hbm_to_vmem [thread:$0]  (!%p1269_p11), %s1263_s24, 128, %s1265_s22, %s217_s29  }
  0x78   : > { %p1400_p1 = scmp.ne.s32.totalorder %s1394_s27, 0 }
  0x79   : > { %s1301_s6 = sand.u32 (!%p1400_p1), 1, %s1034_s16   ;;  %p1401_p12 = scmp.ne.s32.totalorder (!%p1400_p1), %s1391_s25, 0 }
  0x7a   : > { %236 = sbr.rel (%p1400_p1) target bundleno = 582 (0x246), region = 36  ;;  %s673_s26 = sshll.u32 (!%p1400_p1), %s1301_s6, 3 }
  0x7b   : > { %s239_s14 = scalar_lea.sflag (!%p1400_p1), [#allocation3], %s1301_s6  ;;  %s242_s11 = scalar_lea.vmem (!%p1400_p1), [#allocation2], %s673_s26 }
  0x81   : > { %1013 = dma.done.wait (%p1401_p12), %s239_s14, 128  }
  0x82   : > { %1015 = vsyncadd (%p1401_p12), %s239_s14, 4294967168  ;;  %p1402_p13 = scmp.ne.s32.totalorder %s1389_s23, 0 }
  0x84   : > { %1017 = dma.done.wait (%p1402_p13), [#allocation6], 768  }
  0x85   : > { %1019 = vsyncadd (%p1402_p13), [#allocation6], 4294966528 }
  0x86   : > { %1021 = dma.done.wait (%p1402_p13), [#allocation9], 512  }
  0x87   : > { %1023 = vsyncadd (%p1402_p13), [#allocation9], 4294966784  ;;  %vm282_vm0 = vcmask 64512   ;;  %v281_v0 = vld [vmem:[%s242_s11] sm:$0xff]  ;;  %v279_v1 = vld [vmem:[#allocation5] sm:$0xff]  ;;  %vm368_vm1 = vcmask 261120  }
  0x88   : > { %v280_v2 = vld [vmem:[#allocation5 + $0x8] sm:$0xff]  ;;  %706 = vmatprep.subr.mxu0 %v281_v0  ;;  %708 = vmatprep.mubr.msk.f32.mxu0 %vm282_vm0, %v279_v1  ;;  %v364_v3 = vld [vmem:[#allocation7] sm:$0xff]  ;;  %v365_v4 = vld [vmem:[#allocation7 + $0x8] sm:$0xff]  ;;  %s677_s23 = sshll.u32 %s1301_s6, 4  ;;  %s690_s24 = sshll.u32 %s1042_s18, 8 }
  0x89   : > { %v450_v5 = vld [vmem:[#allocation8] sm:$0xff]  ;;  %707 = vmatpush3.msra.mxu0 %v281_v0  ;;  %v733_v6 = vpack.c.bf16 %v365_v4, %v364_v3  ;;  %v451_v7 = vld [vmem:[#allocation8 + $0x8] sm:$0xff]  ;;  %v366_v8 = vld [vmem:[#allocation7 + $0x10] sm:$0xff]  ;;  %s278_s25 = scalar_lea.vmem [#allocation10], %s677_s23  ;;  %s1328_s29 = scalar_lea.hbm %s1383_s4, %s690_s24 }
  0x8a   : > { %v367_v9 = vld [vmem:[#allocation7 + $0x18] sm:$0xff]  ;;  %709 = vmatmul.mubr.msk.f32.vlgmr.msra.gmra.mrb[0].mxu0 %vm282_vm0, %v280_v2  ;;  %v741_v10 = vpack.c.bf16 %v451_v7, %v450_v5  ;;  %v452_v12 = vld [vmem:[#allocation8 + $0x10] sm:$0xff]  ;;  %s549_s27 = sshll.u32 %s278_s25, 4  ;;  %s535_s18 = scalar_lea.sflag [#allocation4], %s1301_s6  ;;  %s1323_s27 = int_to_ptr.vmem [resolvable:$true] %s549_s27 }
  0x8b   : > { %v737_v11 = vpack.c.bf16 %v367_v9, %v366_v8  ;;  %v453_v13 = vld [vmem:[#allocation8 + $0x18] sm:$0xff]  ;;  %734 = vmatprep.subr.bf16.mxu1 %v733_v6  ;;  %s960_s8 = scalar_lea.vmem %s1323_s27, 256  ;;  %s1058_s5 = smov [#allocation10]  }
  0x8c   : > { %v745_v14 = vpack.c.bf16 %v453_v13, %v452_v12  ;;  %742 = vmatprep.subr.bf16.mxu0 %v741_v10  ;;  %736 = vmatpush3.bf16.msra.mxu1 %v733_v6  ;;  %p961_p11 = scmp.ne.s32.totalorder %s1323_s27, %s960_s8  ;;  %s964_s10 = sshll.u32 %s1058_s5, 4  ;;  %s965_s10 = int_to_ptr.vmem [resolvable:$false] %s964_s10 }
  0x8d   : > { %744 = vmatpush3.bf16.msra.mxu0 %v741_v10  ;;  %738 = vmatprep.subr.bf16.mxu1 %v737_v11  ;;  %s966_s12 = scalar_lea.vmem %s965_s10, 512  ;;  %p967_p5 = scmp.lt.s32.totalorder %s1323_s27, %s965_s10 }
  0x8e   : > { %746 = vmatprep.subr.bf16.mxu0 %v745_v14  ;;  %p962_p6 = pnand %p961_p11, %p1246_p10  ;;  %p968_p7 = scmp.lt.s32.totalorder %s966_s12, %s960_s8 }
  0x90   : > { %740 = vmatpush3.bf16.msra.mxu1 %v737_v11  ;;  %p963_p3 = pneg %p962_p6  ;;  %p969_p9 = por %p968_p7, %p967_p5 }
  0x91   : > { %748 = vmatpush3.bf16.msra.mxu0 %v745_v14 }
  0x92   : > { %p970_p0 = pnand %p969_p9, %p963_p3 }
 0x15d   : > { %v710_v15 = vpop.f32.mrb[0].mxu0 }
 0x15e   : > { %v355_v16 = vpop.f32.mrb[1].mxu0 }
 0x15f   : > { %719 = vmatprep.mubr.msk.f32.mxu1 %vm368_vm1, %v355_v16  ;;  %730 = vmatprep.mubr.msk.f32.mxu0 %vm368_vm1, %v355_v16 }
 0x160   : > { %720 = vmatmul.mubr.msk.f32.vlgmr.msra.gmra.mrb[0].mxu1 %vm368_vm1, %v710_v15  ;;  %731 = vmatmul.mubr.msk.f32.vlgmr.msra.gmra.mrb[2].mxu0 %vm368_vm1, %v710_v15 }
 0x233   : > { %v721_v17 = vpop.f32.mrb[0].mxu1  ;;  %v732_v18 = vpop.f32.mrb[2].mxu0 }
 0x234   : > { %v441_v19 = vpop.f32.mrb[1].mxu1  ;;  %v520_v20 = vpop.f32.mrb[3].mxu0 }
 0x235   : > { %v529_v21 = vadd.f32 %v732_v18, %v441_v19  ;;  %v530_v22 = vsub.f32 %v721_v17, %v520_v20 }
 0x237   : > { %531 = vst.msk [vmem:[%s278_s25] sm:$0xff] %vm368_vm1, %v529_v21  ;;  %684 = vst.msk [vmem:[%s278_s25 + $0x8] sm:$0xff] %vm368_vm1, %v530_v22 }
 0x238   : > { %973 = shalt.err (!%p970_p0)
}
 0x239   : > { %s974_s13 = scalar_lea.hbm %s1328_s29, 256  ;;  %s978_s14 = scalar_lea.hbm %s1383_s4, 512 }
 0x23a   : > { %p975_p4 = scmp.ne.s32.totalorder %s1328_s29, %s974_s13  ;;  %p979_p1 = scmp.lt.u32.totalorder %s1328_s29, %s1383_s4 }
 0x23b   : > { %p980_p12 = scmp.lt.u32.totalorder %s978_s14, %s974_s13  ;;  %p982_p11 = scmp.lt.u32.totalorder %s974_s13, %s1328_s29 }
 0x23c   : > { %p976_p2 = pnand %p975_p4, %p1246_p10 }
 0x23d   : > { %p981_p13 = por %p980_p12, %p979_p1 }
 0x23e   : > { %p977_p8 = pneg %p976_p2 }
 0x23f   : > { %p983_p6 = por %p982_p11, %p981_p13 }
 0x241   : > { %p984_p3 = pnand %p983_p6, %p977_p8 }
 0x243   : > { %987 = shalt.err (!%p984_p3)
}
 0x244   : > { %s1059_s25 = smov 128   ;;  %s1060_s24 = smov 8  }
 0x245   : > { %763 = dma.vmem_to_hbm [thread:$0]  (%p1246_p10), %s1323_s27, 256, %s1328_s29, %s535_s18, %s1059_s25, %s1059_s25, %s1060_s24  }
 0x246 PF: > { %s1403_s22 = sld [smem:[#allocation15_spill]]  ;;  %s564_s28 = sand.u32 1, %s1030_s15  }
 0x247   : > { %p1405_p7 = scmp.ge.s32.totalorder %s1050_s20, 2  ;;  %s565_s8 = scalar_lea.sflag [#allocation4], %s564_s28 }
 0x24c   : > { %p1404_p5 = scmp.ne.s32.totalorder %s1403_s22, 0 }
 0x24e   : > { %p780_p9 = pnand %p1405_p7, %p1404_p5 }
 0x250   : > { %1025 = dma.done.wait (!%p780_p9), %s565_s8, 256  }
 0x251   : > { %1027 = vsyncadd (!%p780_p9), %s565_s8, 4294967040  ;;  %s22_s20 = sadd.s32 1, %s1050_s20   ;;  %s1406_s15 = smov %s1034_s16 }
 0x252   : > { %p19_p0 = scmp.ge.s32.totalorder %s22_s20, 4   ;;  %s1407_s16 = smov %s1038_s17 }
 0x253   : > { %s1408_s17 = smov %s1258_s7  ;;  %s1409_s18 = smov %s1046_s19 }
 0x254   : > { %s1410_s19 = smov %s1412_s30  ;;  %21 = sbr.rel (!%p19_p0) target bundleno = 8 (0x8), region = 95 }
 0x25b   :  { %570 = vsyncpa [#allocation3], 1 }
 0x25c   :  { %572 = vsyncpa [#allocation3 + $0x1], 1 }
 0x25d   :  { %573 = vsyncpa [#allocation6], 1 }
 0x25e   :  { %574 = vsyncpa [#allocation9], 1 }
 0x25f   :  { %575 = vsyncpa [#allocation4], 1 }
 0x260   :  { %577 = vsyncpa [#allocation4 + $0x1], 1 }

</bundles_post_ra>
